<compile_context>
chip_gen: v7x
topology: tpu7x:2x2x1
jax: 0.10.0
libtpu: 0.0.40
codegen_flags: <defaults>
</compile_context>

<pallas_src>
import jax
import jax.numpy as jnp
from jax.experimental import pallas as pl
from jax.experimental.pallas import tpu as pltpu


def _round_up(v, m):
    return ((v + m - 1) // m) * m


def _mlp_kernel(x_ref, w1_ref, b1_ref, w2_ref, b2_ref, o_ref):
    # fc1 on the MXU.  Cast the x tile (and w1 if needed) to bf16 in-kernel:
    # a no-op when inputs are already bf16, otherwise cheap VPU filler that
    # avoids a separate wrapper-side HBM cast pass.  Accumulate in f32.
    xb = x_ref[...].astype(jnp.bfloat16)
    w1 = w1_ref[...].astype(jnp.bfloat16)
    h = jnp.dot(xb, w1, preferred_element_type=jnp.float32)
    h = jnp.maximum(h + b1_ref[...], 0.0)            # (TB, H) f32, VPU

    # fc2 (out_features=1): VPU multiply-add over 128-lane chunks, then a
    # single 128-wide cross-lane reduce (XLU), all in f32.  H is a static
    # multiple of 128 (wrapper pads the hidden dim), so slices are lane-tile
    # aligned views.
    w2 = w2_ref[...]                                 # (1, H) f32
    H = h.shape[-1]
    acc = h[:, 0:128] * w2[:, 0:128]
    for c in range(128, H, 128):                     # unrolled at trace time
        acc = acc + h[:, c:c + 128] * w2[:, c:c + 128]
    o = jnp.sum(acc, axis=-1, keepdims=True) + b2_ref[0, 0]
    o_ref[...] = o.astype(o_ref.dtype)               # (TB, 1)


def mlp_forward(x, w1, b1, w2, b2, *, block_b=1024):
    """x: (B, D_in) f32 or bf16; w1: (D_in, H) bf16; b1/w2: (1, H) f32; b2: (1, 1) f32."""
    B, d_in = x.shape
    d_hid = w1.shape[1]
    assert b1.shape == (1, d_hid) and w2.shape == (1, d_hid) and b2.shape == (1, 1)

    # Pad hidden dim to a multiple of 128 with zero columns (exactly preserves
    # the output: extra units have zero weight everywhere).  Weights are tiny;
    # ideally this happens once at parameter-prep time (make_params does so).
    d_hid_p = max(128, _round_up(d_hid, 128))
    if d_hid_p != d_hid:
        pad = d_hid_p - d_hid
        w1 = jnp.pad(w1, ((0, 0), (0, pad)))
        b1 = jnp.pad(b1, ((0, 0), (0, pad)))
        w2 = jnp.pad(w2, ((0, 0), (0, pad)))

    # Batch tile: multiple of 256 (MXU M-tile on v6e/v7x, full bf16 sublane
    # packs), capped by block_b, covering small batches in one step, and capped
    # so large batches give >= ~8 grid steps (keeps both v7x TCs balanced).
    tb = min(block_b, _round_up(B, 256))
    tb = min(tb, max(256, _round_up(pl.cdiv(B, 8), 256)))
    tb = max(256, (tb // 256) * 256)
    grid_b = pl.cdiv(B, tb)   # ragged tail block: OOB reads ignored, OOB writes dropped

    return pl.pallas_call(
        _mlp_kernel,
        out_shape=jax.ShapeDtypeStruct((B, 1), jnp.float32),
        grid_spec=pltpu.PrefetchScalarGridSpec(
            num_scalar_prefetch=0,
            grid=(grid_b,),
            in_specs=[
                pl.BlockSpec((tb, d_in), lambda i: (i, 0)),        # x tile (pipelined)
                pl.BlockSpec((d_in, d_hid_p), lambda i: (0, 0)),   # w1 (VMEM resident, bf16)
                pl.BlockSpec((1, d_hid_p), lambda i: (0, 0)),      # b1 (resident, f32)
                pl.BlockSpec((1, d_hid_p), lambda i: (0, 0)),      # w2 lane-dense (resident, f32)
                pl.BlockSpec(memory_space=pltpu.MemorySpace.SMEM), # b2 scalar
            ],
            out_specs=pl.BlockSpec((tb, 1), lambda i: (i, 0)),
        ),
        compiler_params=pltpu.CompilerParams(
            dimension_semantics=("parallel",),   # shards batch across 2 TCs on v7x
        ),
    )(x, w1, b1, w2, b2)


def make_params(key, image_hidden_size, bert_hidden_size):
    """Synthetic params matching nn.Linear shapes.

    PyTorch stores Linear weight as (out, in); here w1 is kept transposed
    (in, out) in bf16 for x @ W, and w2 is kept lane-dense as (1, H) f32 for
    the VPU/XLU fc2 reduction.  (mlp_forward zero-pads H to a multiple of 128
    if needed, so padding here is optional.)
    """
    d_in = image_hidden_size + bert_hidden_size
    d_hid = d_in // 2
    k1, k2, k3, k4 = jax.random.split(key, 4)
    s1 = 1.0 / jnp.sqrt(d_in)
    s2 = 1.0 / jnp.sqrt(d_hid)
    w1 = jax.random.uniform(k1, (d_in, d_hid), jnp.float32, -s1, s1).astype(jnp.bfloat16)
    b1 = jax.random.uniform(k2, (1, d_hid), jnp.float32, -s1, s1)
    w2 = jax.random.uniform(k3, (1, d_hid), jnp.float32, -s2, s2)
    b2 = jax.random.uniform(k4, (1, 1), jnp.float32, -s2, s2)
    return w1, b1, w2, b2


if __name__ == "__main__":
    key = jax.random.PRNGKey(0)
    kx, kp = jax.random.split(key)

    # Small stand-ins: real module uses bert-large hidden_size=1024, so
    # d_in = image_hidden + 1024.  These shapes exercise the hidden-dim pad
    # path (d_hid=96 -> 128), a multi-step grid, and a ragged tail block.
    image_hidden_size = 64
    bert_hidden_size = 128
    batch = 600                 # tb=256 -> grid=(3,), tail block of 88 rows
    d_in = image_hidden_size + bert_hidden_size

    x = jax.random.normal(kx, (batch, d_in), dtype=jnp.float32)
    w1, b1, w2, b2 = make_params(kp, image_hidden_size, bert_hidden_size)

    out = jax.block_until_ready(mlp_forward(x, w1, b1, w2, b2))

    # Reference in plain JAX with matching bf16 fc1 inputs / f32 accumulation.
    xb = x.astype(jnp.bfloat16).astype(jnp.float32)
    w1f = w1.astype(jnp.float32)
    h_ref = jnp.maximum(xb @ w1f + b1, 0.0)
    ref = jnp.sum(h_ref * w2, axis=-1, keepdims=True) + b2[0, 0]

    assert out.shape == (batch, 1)
    assert jnp.allclose(out, ref, atol=2e-3, rtol=2e-3), (
        float(jnp.max(jnp.abs(out - ref))))

    print("KERNEL_OK")
</pallas_src>

<mosaic_0001>
module attributes {stable_mosaic.version = 11 : i64} {
  func.func @_mlp_kernel(%arg0: i32, %arg1: memref<256x192xf32, #tpu.memory_space<vmem>>, %arg2: memref<192x128xbf16, #tpu.memory_space<vmem>>, %arg3: memref<1x128xf32, #tpu.memory_space<vmem>>, %arg4: memref<1x128xf32, #tpu.memory_space<vmem>>, %arg5: memref<1x1xf32, #tpu.memory_space<smem>>, %arg6: memref<256x1xf32, #tpu.memory_space<vmem>>) attributes {dimension_semantics = [#tpu.dimension_semantics<parallel>], iteration_bounds = array<i64: 3>, scalar_prefetch = 0 : i64, scratch_operands = 0 : i64, tpu.core_type = #tpu.core_type<tc>, window_params = [{transform_indices = @transform_0, window_bounds = array<i64: 256, 192>}, {pipeline_mode = #tpu.pipeline_mode<synchronous>, transform_indices = @transform_1, window_bounds = array<i64: 192, 128>}, {pipeline_mode = #tpu.pipeline_mode<synchronous>, transform_indices = @transform_2, window_bounds = array<i64: 1, 128>}, {pipeline_mode = #tpu.pipeline_mode<synchronous>, transform_indices = @transform_3, window_bounds = array<i64: 1, 128>}, {transform_indices = @transform_4, window_bounds = array<i64: 1, 1>}, {transform_indices = @transform_5, window_bounds = array<i64: 256, 1>}]} {
    %c0 = arith.constant 0 : index
    %c0_0 = arith.constant 0 : index
    %0 = vector.load %arg1[%c0, %c0_0] : memref<256x192xf32, #tpu.memory_space<vmem>>, vector<256x192xf32>
    %1 = arith.truncf %0 : vector<256x192xf32> to vector<256x192xbf16>
    %c0_1 = arith.constant 0 : index
    %c0_2 = arith.constant 0 : index
    %2 = vector.load %arg2[%c0_1, %c0_2] : memref<192x128xbf16, #tpu.memory_space<vmem>>, vector<192x128xbf16>
    %cst = arith.constant dense<0.000000e+00> : vector<256x128xf32>
    %3 = tpu.matmul %1, %2, %cst {dimension_numbers = #tpu.dot_dimension_numbers<[1], [0], [0], [1], [0, 0, 1, 1], [], []>} : vector<256x192xbf16>, vector<192x128xbf16>, vector<256x128xf32> -> vector<256x128xf32>
    %c0_3 = arith.constant 0 : index
    %c0_4 = arith.constant 0 : index
    %4 = vector.load %arg3[%c0_3, %c0_4] : memref<1x128xf32, #tpu.memory_space<vmem>>, vector<1x128xf32>
    %5 = vector.broadcast %4 : vector<1x128xf32> to vector<256x128xf32>
    %6 = arith.addf %3, %5 : vector<256x128xf32>
    %cst_5 = arith.constant 0.000000e+00 : f32
    %7 = vector.broadcast %cst_5 : f32 to vector<256x128xf32>
    %8 = arith.maximumf %6, %7 : vector<256x128xf32>
    %c0_6 = arith.constant 0 : index
    %c0_7 = arith.constant 0 : index
    %9 = vector.load %arg4[%c0_6, %c0_7] : memref<1x128xf32, #tpu.memory_space<vmem>>, vector<1x128xf32>
    %10 = vector.broadcast %9 : vector<1x128xf32> to vector<256x128xf32>
    %11 = arith.mulf %8, %10 : vector<256x128xf32>
    %cst_8 = arith.constant dense<0.000000e+00> : vector<256xf32>
    %12 = vector.multi_reduction <add>, %11, %cst_8 [1] : vector<256x128xf32> to vector<256xf32>
    %13 = vector.shape_cast %12 : vector<256xf32> to vector<256x1xf32>
    %c0_9 = arith.constant 0 : index
    %c0_10 = arith.constant 0 : index
    %14 = memref.load %arg5[%c0_9, %c0_10] : memref<1x1xf32, #tpu.memory_space<smem>>
    %15 = vector.broadcast %14 : f32 to vector<256x1xf32>
    %16 = arith.addf %13, %15 : vector<256x1xf32>
    %c0_11 = arith.constant 0 : index
    %c0_12 = arith.constant 0 : index
    %17 = vector.load %arg6[%c0_11, %c0_12] : memref<256x1xf32, #tpu.memory_space<vmem>>, vector<256x1xf32>
    tpu.vector_store %arg6[%c0_11, %c0_12], %16 {strides = array<i32>} : memref<256x1xf32, #tpu.memory_space<vmem>>, vector<256x1xf32>,
    return
  }
  func.func @transform_0(%arg0: i32) -> (i32, i32) {
    %c0_i32 = arith.constant 0 : i32
    %c0_i32_0 = arith.constant 0 : i32
    return %arg0, %c0_i32 : i32, i32
  }
  func.func @transform_1(%arg0: i32) -> (i32, i32) {
    %c0_i32 = arith.constant 0 : i32
    %c0_i32_0 = arith.constant 0 : i32
    %c0_i32_1 = arith.constant 0 : i32
    return %c0_i32, %c0_i32_0 : i32, i32
  }
  func.func @transform_2(%arg0: i32) -> (i32, i32) {
    %c0_i32 = arith.constant 0 : i32
    %c0_i32_0 = arith.constant 0 : i32
    %c0_i32_1 = arith.constant 0 : i32
    return %c0_i32, %c0_i32_0 : i32, i32
  }
  func.func @transform_3(%arg0: i32) -> (i32, i32) {
    %c0_i32 = arith.constant 0 : i32
    %c0_i32_0 = arith.constant 0 : i32
    %c0_i32_1 = arith.constant 0 : i32
    return %c0_i32, %c0_i32_0 : i32, i32
  }
  func.func @transform_4(%arg0: i32) -> (i32, i32) {
    %c0_i32 = arith.constant 0 : i32
    %c0_i32_0 = arith.constant 0 : i32
    %c0_i32_1 = arith.constant 0 : i32
    return %c0_i32, %c0_i32_0 : i32, i32
  }
  func.func @transform_5(%arg0: i32) -> (i32, i32) {
    %c0_i32 = arith.constant 0 : i32
    %c0_i32_0 = arith.constant 0 : i32
    return %arg0, %c0_i32 : i32, i32
  }
}

</mosaic_0001>

<bundles_post_ra>
// kernel: tpu_custom_call.1
= control target key start
LH: loop header
LB: loop body
LE: loop exit
PB: predicated region body
PF: predicated region fallthrough
CT: control target
= control target key end

     0   :  { %s2005_s0 = inlined_call_operand.vmem [shape: f32[600,192], index: 0, kind: input, shape index: {}]   ;;  %s2006_s1 = inlined_call_operand.vmem [shape: bf16[192,128], index: 1, kind: input, shape index: {}]   ;;  %s2007_s2 = inlined_call_operand.vmem [shape: f32[1,128], index: 2, kind: input, shape index: {}]   ;;  %s2008_s3 = inlined_call_operand.vmem [shape: f32[1,128], index: 3, kind: input, shape index: {}]   ;;  %s2009_s4 = inlined_call_operand.<no memory space> [shape: f32[1,1], index: 4, kind: input, shape index: {}]   ;;  %s2010_s5 = inlined_call_operand.vmem [shape: f32[600,1], index: 5, kind: output, shape index: {}]  }
   0x1   :  { %10 = sst [smem:[#allocation2]] %s2009_s4 }
   0x2   :  { %s1512_s20 = smov 0   ;;  %s1514_s21 = smov 0  }
   0x3   :  { %s1516_s22 = smov 0  }
   0x4 LB: > { %s1525_s4 = sadd.s32 4294967295, %s1444_s22   ;;  %s1527_s23 = sadd.s32 1, %s1444_s22   ;;  %s1444_s22 = sphi %s1516_s22, %s2019_s22   ;;  %s1440_s21 = sphi %s1514_s21, %s2018_s21   ;;  %s1436_s20 = sphi %s1512_s20, %s2017_s20  }
   0x5   : > { %s130_s24 = ssub.s32 %s1444_s22, %s1527_s23  ;;  %s133_s25 = sadd.s32 1, %s1440_s21 }
   0x6   : > { %p131_p0 = scmp.eq.s32.totalorder %s130_s24, 0  ;;  %p143_p1 = scmp.ne.s32.totalorder %s1440_s21, %s1436_s20 }
   0x7   : > { %p144_p2 = scmp.eq.s32.totalorder %s1525_s4, 2  ;;  %p1209_p3 = scmp.ge.s32.totalorder %s1444_s22, 1 }
   0x8   : > { %s1535_s26 = scalar_select %p131_p0, %s1440_s21, %s133_s25  }
   0x9   : > { %p1537_p4 = por %p144_p2, %p143_p1  ;;  %p200_p5 = scmp.lt.s32.totalorder %s1444_s22, 4 }
   0xb   : > { %p201_p6 = pnand %p1209_p3, %p200_p5 }
   0xc   : > { %v1378_v0 = vld [vmem:[%s2006_s1] sm:$0xff] (!%p201_p6)   ;;  %v1478_v1 = vmov (!%p201_p6), 0   ;;  %s1547_s30 = sshll.u32 (!%p201_p6), %s1525_s4, 5  ;;  %v1379_v2 = vld [vmem:[%s2006_s1 + $0x8] sm:$0xff] (!%p201_p6)   ;;  %v1380_v3 = vld [vmem:[%s2006_s1 + $0x10] sm:$0xff] (!%p201_p6)   ;;  %vm455_vm0 = vcmask (!%p201_p6), 523264  }
   0xd   : > { %204 = sbr.rel (%p201_p6) target bundleno = 544 (0x220), region = 40  ;;  %504 = vmatprep.subr.bf16.mxu0 (!%p201_p6), %v1478_v1  ;;  %1265 = vmatprep.subr.bf16.mxu1 (!%p201_p6), %v1478_v1  ;;  %p239_p7 = scmp.lt.s32.totalorder (!%p201_p6), %s1547_s30, 74  ;;  %v1381_v4 = vld [vmem:[%s2006_s1 + $0x18] sm:$0xff] (!%p201_p6)   ;;  %v1382_v10 = vld [vmem:[%s2006_s1 + $0x20] sm:$0xff] (!%p201_p6)   ;;  %v1383_v12 = vld [vmem:[%s2006_s1 + $0x28] sm:$0xff] (!%p201_p6)   ;;  %vm834_vm1 = vcmask (!%p201_p6), 7168  }
   0xe   : > { %505 = vmatpush1.bf16.msra.mxu0 (!%p201_p6), %v1378_v0  ;;  %1277 = vmatpush1.bf16.msra.mxu1 (!%p201_p6), %v1378_v0  ;;  %v1384_v13 = vld [vmem:[%s2006_s1 + $0x30] sm:$0xff] (!%p201_p6)   ;;  %v1385_v14 = vld [vmem:[%s2006_s1 + $0x38] sm:$0xff] (!%p201_p6)   ;;  %v1386_v15 = vld [vmem:[%s2006_s1 + $0x40] sm:$0xff] (!%p201_p6)   ;;  %s800_s18 = sld [smem:[#allocation2]] (!%p201_p6)  ;;  %s230_s19 = sand.u32 (!%p201_p6), 1, %s1436_s20  }
   0xf   : > { %506 = vmatprep.subr.bf16.mxu0 (!%p201_p6), %v1478_v1  ;;  %1266 = vmatprep.subr.bf16.mxu1 (!%p201_p6), %v1478_v1  ;;  %v1387_v16 = vld [vmem:[%s2006_s1 + $0x48] sm:$0xff] (!%p201_p6)   ;;  %v1388_v17 = vld [vmem:[%s2006_s1 + $0x50] sm:$0xff] (!%p201_p6)   ;;  %v1389_v18 = vld [vmem:[%s2006_s1 + $0x58] sm:$0xff] (!%p201_p6)   ;;  %s1210_s22 = sshll.u32 (!%p201_p6), %s230_s19, 8 }
  0x10   : > { %s1769_s24 = scalar_lea.vmem (!%p201_p6), [#allocation3], %s1210_s22  }
  0x12   : > { %507 = vmatpush1.bf16.msra.mxu0 (!%p201_p6), %v1379_v2  ;;  %1278 = vmatpush1.bf16.msra.mxu1 (!%p201_p6), %v1379_v2 }
  0x13   : > { %508 = vmatprep.subr.bf16.mxu0 (!%p201_p6), %v1478_v1  ;;  %1267 = vmatprep.subr.bf16.mxu1 (!%p201_p6), %v1478_v1 }
  0x14   : > { %s240_s8 = scalar_select %p239_p7, %s1547_s30, 74 }
  0x15   : > { %s875_s20 = ssub.s32 (%p1537_p4), 75, %s1547_s30  ;;  %s1262_s25 = sshll.u32 (%p1537_p4), %s1525_s4, 8 }
  0x16   : > { %s1261_s11 = sshll.u32 %s240_s8, 4  ;;  %509 = vmatpush1.bf16.msra.mxu0 %v1380_v3  ;;  %1279 = vmatpush1.bf16.msra.mxu1 %v1380_v3  ;;  %p876_p8 = scmp.lt.s32.totalorder (%p1537_p4), %s875_s20, 32 }
  0x17   : > { %s1564_s14 = scalar_lea.vmem %s2005_s0, %s1261_s11  ;;  %510 = vmatprep.subr.bf16.mxu0 %v1478_v1  ;;  %1268 = vmatprep.subr.bf16.mxu1 %v1478_v1  ;;  %s1873_s6 = scalar_lea.vmem (%p1537_p4), %s2010_s5, %s1262_s25  }
  0x18   : > { %v257_v5 = vld [vmem:[%s1564_s14 + $0x8] sm:$0xff]  ;;  %v259_v6 = vld [vmem:[%s1564_s14 + $0x18] sm:$0xff]  ;;  %v256_v19 = vld [vmem:[%s1564_s14] sm:$0xff] }
  0x19   : > { %v289_v7 = vld [vmem:[%s1564_s14 + $0x108] sm:$0xff]  ;;  %v321_v8 = vpack.c.bf16 %v259_v6, %v257_v5  ;;  %v291_v9 = vld [vmem:[%s1564_s14 + $0x118] sm:$0xff]  ;;  %v258_v20 = vld [vmem:[%s1564_s14 + $0x10] sm:$0xff] }
  0x1a   : > { %511 = vmatpush1.bf16.msra.mxu0 %v1381_v4  ;;  %1280 = vmatpush1.bf16.msra.mxu1 %v1381_v4  ;;  %v337_v11 = vpack.c.bf16 %v291_v9, %v289_v7  ;;  %v288_v21 = vld [vmem:[%s1564_s14 + $0x100] sm:$0xff]  ;;  %v290_v22 = vld [vmem:[%s1564_s14 + $0x110] sm:$0xff]  ;;  %v261_v23 = vld [vmem:[%s1564_s14 + $0x28] sm:$0xff]  ;;  %v320_v27 = vpack.c.bf16 %v258_v20, %v256_v19 }
  0x1b   : > { %512 = vmatprep.subr.bf16.mxu0 %v1478_v1  ;;  %1269 = vmatprep.subr.bf16.mxu1 %v1478_v1  ;;  %v263_v24 = vld [vmem:[%s1564_s14 + $0x38] sm:$0xff]  ;;  %v293_v25 = vld [vmem:[%s1564_s14 + $0x128] sm:$0xff]  ;;  %v336_v28 = vpack.c.bf16 %v290_v22, %v288_v21  ;;  %v260_v31 = vld [vmem:[%s1564_s14 + $0x20] sm:$0xff] }
  0x1c   : > { %1227 = vmatprep.mubr.msk.bf16.mxu0 %vm455_vm0, %v321_v8  ;;  %1235 = vmatprep.mubr.msk.bf16.mxu1 %vm455_vm0, %v337_v11  ;;  %v295_v26 = vld [vmem:[%s1564_s14 + $0x138] sm:$0xff]  ;;  %v323_v29 = vpack.c.bf16 %v263_v24, %v261_v23  ;;  %v262_v32 = vld [vmem:[%s1564_s14 + $0x30] sm:$0xff]  ;;  %v292_v33 = vld [vmem:[%s1564_s14 + $0x120] sm:$0xff] }
  0x1d   : > { %v339_v30 = vpack.c.bf16 %v295_v26, %v293_v25  ;;  %v294_v34 = vld [vmem:[%s1564_s14 + $0x130] sm:$0xff]  ;;  %v265_v35 = vld [vmem:[%s1564_s14 + $0x48] sm:$0xff]  ;;  %v267_v36 = vld [vmem:[%s1564_s14 + $0x58] sm:$0xff]  ;;  %v322_v39 = vpack.c.bf16 %v262_v32, %v260_v31 }
  0x1e   : > { %513 = vmatpush1.bf16.msra.mxu0 %v1382_v10  ;;  %1281 = vmatpush1.bf16.msra.mxu1 %v1382_v10  ;;  %v297_v37 = vld [vmem:[%s1564_s14 + $0x148] sm:$0xff]  ;;  %v299_v38 = vld [vmem:[%s1564_s14 + $0x158] sm:$0xff]  ;;  %v338_v40 = vpack.c.bf16 %v294_v34, %v292_v33  ;;  %v325_v41 = vpack.c.bf16 %v267_v36, %v265_v35  ;;  %v264_v43 = vld [vmem:[%s1564_s14 + $0x40] sm:$0xff] }
  0x1f   : > { %514 = vmatprep.subr.bf16.mxu0 %v1478_v1  ;;  %1270 = vmatprep.subr.bf16.mxu1 %v1478_v1  ;;  %v341_v42 = vpack.c.bf16 %v299_v38, %v297_v37  ;;  %v266_v44 = vld [vmem:[%s1564_s14 + $0x50] sm:$0xff]  ;;  %v296_v45 = vld [vmem:[%s1564_s14 + $0x140] sm:$0xff]  ;;  %v269_v47 = vld [vmem:[%s1564_s14 + $0x68] sm:$0xff] }
  0x20   : > { %v298_v46 = vld [vmem:[%s1564_s14 + $0x150] sm:$0xff]  ;;  %v271_v48 = vld [vmem:[%s1564_s14 + $0x78] sm:$0xff]  ;;  %v301_v49 = vld [vmem:[%s1564_s14 + $0x168] sm:$0xff]  ;;  %v324_v51 = vpack.c.bf16 %v266_v44, %v264_v43 }
  0x21   : > { %v303_v50 = vld [vmem:[%s1564_s14 + $0x178] sm:$0xff]  ;;  %v340_v52 = vpack.c.bf16 %v298_v46, %v296_v45  ;;  %v327_v53 = vpack.c.bf16 %v271_v48, %v269_v47  ;;  %v268_v55 = vld [vmem:[%s1564_s14 + $0x60] sm:$0xff]  ;;  %v270_v56 = vld [vmem:[%s1564_s14 + $0x70] sm:$0xff] }
  0x22   : > { %515 = vmatpush1.bf16.msra.mxu0 %v1383_v12  ;;  %1282 = vmatpush1.bf16.msra.mxu1 %v1383_v12  ;;  %v343_v54 = vpack.c.bf16 %v303_v50, %v301_v49  ;;  %v300_v57 = vld [vmem:[%s1564_s14 + $0x160] sm:$0xff]  ;;  %v302_v58 = vld [vmem:[%s1564_s14 + $0x170] sm:$0xff]  ;;  %v273_v59 = vld [vmem:[%s1564_s14 + $0x88] sm:$0xff]  ;;  %v326_v63 = vpack.c.bf16 %v270_v56, %v268_v55 }
  0x23   : > { %516 = vmatprep.subr.bf16.mxu0 %v1478_v1  ;;  %1271 = vmatprep.subr.bf16.mxu1 %v1478_v1  ;;  %v275_v60 = vld [vmem:[%s1564_s14 + $0x98] sm:$0xff]  ;;  %v305_v61 = vld [vmem:[%s1564_s14 + $0x188] sm:$0xff]  ;;  %v342_v0 = vpack.c.bf16 %v302_v58, %v300_v57  ;;  %v272_v3 = vld [vmem:[%s1564_s14 + $0x80] sm:$0xff] }
  0x24   : > { %v307_v62 = vld [vmem:[%s1564_s14 + $0x198] sm:$0xff]  ;;  %v274_v4 = vld [vmem:[%s1564_s14 + $0x90] sm:$0xff]  ;;  %v304_v5 = vld [vmem:[%s1564_s14 + $0x180] sm:$0xff] }
  0x25   : > { %v345_v2 = vpack.c.bf16 %v307_v62, %v305_v61  ;;  %v306_v6 = vld [vmem:[%s1564_s14 + $0x190] sm:$0xff]  ;;  %v277_v7 = vld [vmem:[%s1564_s14 + $0xa8] sm:$0xff]  ;;  %v279_v8 = vld [vmem:[%s1564_s14 + $0xb8] sm:$0xff]  ;;  %v328_v11 = vpack.c.bf16 %v274_v4, %v272_v3 }
  0x26   : > { %517 = vmatpush1.bf16.msra.mxu0 %v1384_v13  ;;  %1283 = vmatpush1.bf16.msra.mxu1 %v1384_v13  ;;  %v309_v9 = vld [vmem:[%s1564_s14 + $0x1a8] sm:$0xff]  ;;  %v311_v10 = vld [vmem:[%s1564_s14 + $0x1b8] sm:$0xff]  ;;  %v344_v12 = vpack.c.bf16 %v306_v6, %v304_v5  ;;  %v331_v13 = vpack.c.bf16 %v279_v8, %v277_v7  ;;  %v1694_v45 = vld [vmem:[%s2007_s2] ss:$0 sm:$0xff] }
  0x27   : > { %518 = vmatprep.subr.bf16.mxu0 %v1478_v1  ;;  %1272 = vmatprep.subr.bf16.mxu1 %v1478_v1  ;;  %v281_v19 = vld [vmem:[%s1564_s14 + $0xc8] sm:$0xff]  ;;  %v283_v20 = vld [vmem:[%s1564_s14 + $0xd8] sm:$0xff] }
  0x28   : > { %v313_v21 = vld [vmem:[%s1564_s14 + $0x1c8] sm:$0xff]  ;;  %v315_v22 = vld [vmem:[%s1564_s14 + $0x1d8] sm:$0xff]  ;;  %v333_v25 = vpack.c.bf16 %v283_v20, %v281_v19 }
  0x29   : > { %v349_v26 = vpack.c.bf16 %v315_v22, %v313_v21  ;;  %v285_v31 = vld [vmem:[%s1564_s14 + $0xe8] sm:$0xff]  ;;  %v287_v32 = vld [vmem:[%s1564_s14 + $0xf8] sm:$0xff] }
  0x2a   : > { %519 = vmatpush1.bf16.msra.mxu0 %v1385_v14  ;;  %1284 = vmatpush1.bf16.msra.mxu1 %v1385_v14  ;;  %v347_v14 = vpack.c.bf16 %v311_v10, %v309_v9  ;;  %v317_v33 = vld [vmem:[%s1564_s14 + $0x1e8] sm:$0xff]  ;;  %v319_v34 = vld [vmem:[%s1564_s14 + $0x1f8] sm:$0xff]  ;;  %v335_v37 = vpack.c.bf16 %v287_v32, %v285_v31 }
  0x2b   : > { %520 = vmatprep.subr.bf16.mxu0 %v1478_v1  ;;  %1273 = vmatprep.subr.bf16.mxu1 %v1478_v1  ;;  %v351_v38 = vpack.c.bf16 %v319_v34, %v317_v33 }
  0x2e   : > { %521 = vmatpush1.bf16.msra.mxu0 %v1386_v15  ;;  %1285 = vmatpush1.bf16.msra.mxu1 %v1386_v15  ;;  %v276_v15 = vld [vmem:[%s1564_s14 + $0xa0] sm:$0xff] }
  0x2f   : > { %522 = vmatprep.subr.bf16.mxu0 %v1478_v1  ;;  %1274 = vmatprep.subr.bf16.mxu1 %v1478_v1 }
  0x32   : > { %523 = vmatpush1.bf16.msra.mxu0 %v1387_v16  ;;  %1286 = vmatpush1.bf16.msra.mxu1 %v1387_v16  ;;  %v278_v16 = vld [vmem:[%s1564_s14 + $0xb0] sm:$0xff] }
  0x33   : > { %524 = vmatprep.subr.bf16.mxu0 %v1478_v1  ;;  %1275 = vmatprep.subr.bf16.mxu1 %v1478_v1  ;;  %v330_v23 = vpack.c.bf16 %v278_v16, %v276_v15 }
  0x36   : > { %525 = vmatpush1.bf16.msra.mxu0 %v1388_v17  ;;  %1287 = vmatpush1.bf16.msra.mxu1 %v1388_v17  ;;  %v308_v17 = vld [vmem:[%s1564_s14 + $0x1a0] sm:$0xff] }
  0x37   : > { %526 = vmatprep.subr.bf16.mxu0 %v1478_v1  ;;  %1276 = vmatprep.subr.bf16.mxu1 %v1478_v1  ;;  %v329_v1 = vpack.c.bf16 %v275_v60, %v273_v59 }
  0x3a   : > { %527 = vmatpush1.bf16.msra.mxu0 %v1389_v18  ;;  %1288 = vmatpush1.bf16.msra.mxu1 %v1389_v18  ;;  %v310_v18 = vld [vmem:[%s1564_s14 + $0x1b0] sm:$0xff] }
  0x3b   : > { %v346_v24 = vpack.c.bf16 %v310_v18, %v308_v17 }
  0x3d   : > { %537 = vmatmul.mubr.bf16.vlgmr.msra.gmra.mrb[0].mxu0 %v320_v27  ;;  %601 = vmatmul.mubr.bf16.vlgmr.msra.gmra.mrb[0].mxu1 %v336_v28  ;;  %v280_v27 = vld [vmem:[%s1564_s14 + $0xc0] sm:$0xff]  ;;  %v282_v28 = vld [vmem:[%s1564_s14 + $0xd0] sm:$0xff] }
  0x3e   : > { %1228 = vmatprep.mubr.msk.bf16.mxu0 %vm455_vm0, %v323_v29  ;;  %1236 = vmatprep.mubr.msk.bf16.mxu1 %vm455_vm0, %v339_v30  ;;  %v312_v29 = vld [vmem:[%s1564_s14 + $0x1c0] sm:$0xff]  ;;  %v314_v30 = vld [vmem:[%s1564_s14 + $0x1d0] sm:$0xff]  ;;  %v332_v35 = vpack.c.bf16 %v282_v28, %v280_v27 }
  0x3f   : > { %v348_v36 = vpack.c.bf16 %v314_v30, %v312_v29 }
  0x45   : > { %545 = vmatmul.mubr.bf16.gmra.mrb[4].mxu0 %v322_v39  ;;  %609 = vmatmul.mubr.bf16.gmra.mrb[4].mxu1 %v338_v40  ;;  %v284_v39 = vld [vmem:[%s1564_s14 + $0xe0] sm:$0xff]  ;;  %v286_v40 = vld [vmem:[%s1564_s14 + $0xf0] sm:$0xff] }
  0x46   : > { %1229 = vmatprep.mubr.msk.bf16.mxu0 %vm455_vm0, %v325_v41  ;;  %1237 = vmatprep.mubr.msk.bf16.mxu1 %vm455_vm0, %v341_v42  ;;  %v316_v41 = vld [vmem:[%s1564_s14 + $0x1e0] sm:$0xff]  ;;  %v318_v42 = vld [vmem:[%s1564_s14 + $0x1f0] sm:$0xff]  ;;  %v334_v43 = vpack.c.bf16 %v286_v40, %v284_v39 }
  0x47   : > { %v350_v44 = vpack.c.bf16 %v318_v42, %v316_v41 }
  0x4d   : > { %553 = vmatmul.mubr.bf16.gmra.mrb[8].mxu0 %v324_v51  ;;  %617 = vmatmul.mubr.bf16.gmra.mrb[8].mxu1 %v340_v52 }
  0x4e   : > { %1230 = vmatprep.mubr.msk.bf16.mxu0 %vm455_vm0, %v327_v53  ;;  %1238 = vmatprep.mubr.msk.bf16.mxu1 %vm455_vm0, %v343_v54  ;;  %v1701_v54 = vld [vmem:[%s2008_s3] ss:$0 sm:$0xff] }
  0x55   : > { %561 = vmatmul.mubr.bf16.gmra.mrb[12].mxu0 %v326_v63  ;;  %625 = vmatmul.mubr.bf16.gmra.mrb[12].mxu1 %v342_v0 }
  0x56   : > { %1231 = vmatprep.mubr.msk.bf16.mxu0 %vm455_vm0, %v329_v1  ;;  %1239 = vmatprep.mubr.msk.bf16.mxu1 %vm455_vm0, %v345_v2 }
  0x5d   : > { %569 = vmatmul.mubr.bf16.gmra.mrb[16].mxu0 %v328_v11  ;;  %633 = vmatmul.mubr.bf16.gmra.mrb[16].mxu1 %v344_v12 }
  0x5e   : > { %1232 = vmatprep.mubr.msk.bf16.mxu0 %vm455_vm0, %v331_v13  ;;  %1240 = vmatprep.mubr.msk.bf16.mxu1 %vm455_vm0, %v347_v14 }
  0x65   : > { %577 = vmatmul.mubr.bf16.gmra.mrb[20].mxu0 %v330_v23  ;;  %641 = vmatmul.mubr.bf16.gmra.mrb[20].mxu1 %v346_v24 }
  0x66   : > { %1233 = vmatprep.mubr.msk.bf16.mxu0 %vm455_vm0, %v333_v25  ;;  %1241 = vmatprep.mubr.msk.bf16.mxu1 %vm455_vm0, %v349_v26 }
  0x6d   : > { %585 = vmatmul.mubr.bf16.gmra.mrb[24].mxu0 %v332_v35  ;;  %649 = vmatmul.mubr.bf16.gmra.mrb[24].mxu1 %v348_v36 }
  0x6e   : > { %1234 = vmatprep.mubr.msk.bf16.mxu0 %vm455_vm0, %v335_v37  ;;  %1242 = vmatprep.mubr.msk.bf16.mxu1 %vm455_vm0, %v351_v38 }
  0x75   : > { %593 = vmatmul.mubr.bf16.gmra.mrb[28].mxu0 %v334_v43  ;;  %657 = vmatmul.mubr.bf16.gmra.mrb[28].mxu1 %v350_v44 }
 0x110   : > { %v538_v46 = vpop.f32.mrb[0].mxu0  ;;  %v602_v47 = vpop.f32.mrb[0].mxu1 }
 0x111   : > { %v539_v48 = vadd.f32 %v1694_v45, %v538_v46  ;;  %v603_v49 = vadd.f32 %v1694_v45, %v602_v47  ;;  %v540_v50 = vpop.f32.mrb[1].mxu0  ;;  %v604_v51 = vpop.f32.mrb[1].mxu1 }
 0x112   : > { %v541_v52 = vpop.f32.mrb[2].mxu0  ;;  %v605_v53 = vpop.f32.mrb[2].mxu1 }
 0x113   : > { %v665_v55 = vmax.f32 %v539_v48, 0.0  ;;  %v606_v56 = vadd.f32 %v1694_v45, %v605_v53  ;;  %v543_v57 = vpop.f32.mrb[3].mxu0  ;;  %v607_v58 = vpop.f32.mrb[3].mxu1  ;;  %v681_v59 = vmax.f32 %v603_v49, 0.0  ;;  %v542_v60 = vadd.f32 %v1694_v45, %v541_v52 }
 0x115   : > { %v682_v61 = vmax.f32 %v606_v56, 0.0  ;;  %v704_v62 = vmul.f32 %v1701_v54, %v665_v55  ;;  %v666_v2 = vmax.f32 %v542_v60, 0.0  ;;  %v720_v6 = vmul.f32 %v1701_v54, %v681_v59 }
 0x117   : > { %736 = vadd.xlane.f32.xlu0 %v704_v62  ;;  %v721_v63 = vmul.f32 %v1701_v54, %v682_v61  ;;  %v705_v18 = vmul.f32 %v1701_v54, %v666_v2 }
 0x118   : > { %v546_v0 = vpop.f32.mrb[4].mxu0  ;;  %v610_v1 = vpop.f32.mrb[4].mxu1 }
 0x119   : > { %v547_v3 = vadd.f32 %v1694_v45, %v546_v0  ;;  %770 = vadd.xlane.f32.xlu1 %v721_v63  ;;  %v548_v4 = vpop.f32.mrb[5].mxu0  ;;  %v611_v5 = vadd.f32 %v1694_v45, %v610_v1  ;;  %v612_v7 = vpop.f32.mrb[5].mxu1 }
 0x11a   : > { %v549_v8 = vpop.f32.mrb[6].mxu0  ;;  %v613_v9 = vpop.f32.mrb[6].mxu1 }
 0x11b   : > { %v667_v10 = vmax.f32 %v547_v3, 0.0  ;;  %v550_v11 = vadd.f32 %v1694_v45, %v549_v8  ;;  %v551_v12 = vpop.f32.mrb[7].mxu0  ;;  %v683_v13 = vmax.f32 %v611_v5, 0.0  ;;  %768 = vadd.xlane.f32.xlu0 %v720_v6  ;;  %v615_v14 = vpop.f32.mrb[7].mxu1  ;;  %v614_v16 = vadd.f32 %v1694_v45, %v613_v9 }
 0x11d   : > { %v668_v15 = vmax.f32 %v550_v11, 0.0  ;;  %v706_v17 = vmul.f32 %v1701_v54, %v667_v10  ;;  %v722_v19 = vmul.f32 %v1701_v54, %v683_v13  ;;  %v684_v22 = vmax.f32 %v614_v16, 0.0 }
 0x11f   : > { %740 = vadd.xlane.f32.xlu1 %v706_v17  ;;  %738 = vadd.xlane.f32.xlu0 %v705_v18  ;;  %v707_v26 = vmul.f32 %v1701_v54, %v668_v15  ;;  %v723_v37 = vmul.f32 %v1701_v54, %v684_v22 }
 0x120   : > { %v554_v20 = vpop.f32.mrb[8].mxu0  ;;  %v618_v21 = vpop.f32.mrb[8].mxu1 }
 0x121   : > { %v555_v23 = vadd.f32 %v1694_v45, %v554_v20  ;;  %v556_v24 = vpop.f32.mrb[9].mxu0  ;;  %v619_v25 = vadd.f32 %v1694_v45, %v618_v21  ;;  %v620_v27 = vpop.f32.mrb[9].mxu1 }
 0x122   : > { %v557_v28 = vpop.f32.mrb[10].mxu0  ;;  %v621_v29 = vpop.f32.mrb[10].mxu1 }
 0x123   : > { %v669_v30 = vmax.f32 %v555_v23, 0.0  ;;  %v558_v31 = vadd.f32 %v1694_v45, %v557_v28  ;;  %v559_v32 = vpop.f32.mrb[11].mxu0  ;;  %v685_v33 = vmax.f32 %v619_v25, 0.0  ;;  %742 = vadd.xlane.f32.xlu1 %v707_v26  ;;  %772 = vadd.xlane.f32.xlu0 %v722_v19  ;;  %v623_v34 = vpop.f32.mrb[11].mxu1  ;;  %v622_v36 = vadd.f32 %v1694_v45, %v621_v29 }
 0x125   : > { %v670_v35 = vmax.f32 %v558_v31, 0.0  ;;  %v708_v38 = vmul.f32 %v1701_v54, %v669_v30  ;;  %v724_v39 = vmul.f32 %v1701_v54, %v685_v33  ;;  %v686_v42 = vmax.f32 %v622_v36, 0.0 }
 0x127   : > { %774 = vadd.xlane.f32.xlu1 %v723_v37  ;;  %744 = vadd.xlane.f32.xlu0 %v708_v38  ;;  %v709_v47 = vmul.f32 %v1701_v54, %v670_v35  ;;  %v725_v59 = vmul.f32 %v1701_v54, %v686_v42 }
 0x128   : > { %v562_v40 = vpop.f32.mrb[12].mxu0  ;;  %v626_v41 = vpop.f32.mrb[12].mxu1 }
 0x129   : > { %v563_v43 = vadd.f32 %v1694_v45, %v562_v40  ;;  %v564_v44 = vpop.f32.mrb[13].mxu0  ;;  %v627_v46 = vadd.f32 %v1694_v45, %v626_v41  ;;  %v628_v48 = vpop.f32.mrb[13].mxu1 }
 0x12a   : > { %v565_v49 = vpop.f32.mrb[14].mxu0  ;;  %v629_v50 = vpop.f32.mrb[14].mxu1 }
 0x12b   : > { %v671_v51 = vmax.f32 %v563_v43, 0.0  ;;  %v566_v52 = vadd.f32 %v1694_v45, %v565_v49  ;;  %v567_v53 = vpop.f32.mrb[15].mxu0  ;;  %v687_v55 = vmax.f32 %v627_v46, 0.0  ;;  %746 = vadd.xlane.f32.xlu1 %v709_v47  ;;  %776 = vadd.xlane.f32.xlu0 %v724_v39  ;;  %v631_v56 = vpop.f32.mrb[15].mxu1  ;;  %v630_v58 = vadd.f32 %v1694_v45, %v629_v50 }
 0x12d   : > { %v672_v57 = vmax.f32 %v566_v52, 0.0  ;;  %v710_v60 = vmul.f32 %v1701_v54, %v671_v51  ;;  %v726_v61 = vmul.f32 %v1701_v54, %v687_v55  ;;  %v688_v0 = vmax.f32 %v630_v58, 0.0 }
 0x12f   : > { %778 = vadd.xlane.f32.xlu1 %v725_v59  ;;  %748 = vadd.xlane.f32.xlu0 %v710_v60  ;;  %v711_v4 = vmul.f32 %v1701_v54, %v672_v57  ;;  %v727_v15 = vmul.f32 %v1701_v54, %v688_v0 }
 0x130   : > { %v570_v62 = vpop.f32.mrb[16].mxu0  ;;  %v634_v63 = vpop.f32.mrb[16].mxu1 }
 0x131   : > { %v571_v1 = vadd.f32 %v1694_v45, %v570_v62  ;;  %v572_v2 = vpop.f32.mrb[17].mxu0  ;;  %v635_v3 = vadd.f32 %v1694_v45, %v634_v63  ;;  %v636_v5 = vpop.f32.mrb[17].mxu1 }
 0x132   : > { %v573_v6 = vpop.f32.mrb[18].mxu0  ;;  %v637_v7 = vpop.f32.mrb[18].mxu1 }
 0x133   : > { %v673_v8 = vmax.f32 %v571_v1, 0.0  ;;  %v574_v9 = vadd.f32 %v1694_v45, %v573_v6  ;;  %v575_v10 = vpop.f32.mrb[19].mxu0  ;;  %v689_v11 = vmax.f32 %v635_v3, 0.0  ;;  %750 = vadd.xlane.f32.xlu1 %v711_v4  ;;  %780 = vadd.xlane.f32.xlu0 %v726_v61  ;;  %v639_v12 = vpop.f32.mrb[19].mxu1  ;;  %v638_v14 = vadd.f32 %v1694_v45, %v637_v7 }
 0x135   : > { %v674_v13 = vmax.f32 %v574_v9, 0.0  ;;  %v712_v16 = vmul.f32 %v1701_v54, %v673_v8  ;;  %v728_v17 = vmul.f32 %v1701_v54, %v689_v11  ;;  %v690_v20 = vmax.f32 %v638_v14, 0.0 }
 0x137   : > { %782 = vadd.xlane.f32.xlu1 %v727_v15  ;;  %752 = vadd.xlane.f32.xlu0 %v712_v16  ;;  %v713_v24 = vmul.f32 %v1701_v54, %v674_v13  ;;  %v729_v35 = vmul.f32 %v1701_v54, %v690_v20 }
 0x138   : > { %v578_v18 = vpop.f32.mrb[20].mxu0  ;;  %v642_v19 = vpop.f32.mrb[20].mxu1 }
 0x139   : > { %v579_v21 = vadd.f32 %v1694_v45, %v578_v18  ;;  %v580_v22 = vpop.f32.mrb[21].mxu0  ;;  %v643_v23 = vadd.f32 %v1694_v45, %v642_v19  ;;  %v644_v25 = vpop.f32.mrb[21].mxu1 }
 0x13a   : > { %v581_v26 = vpop.f32.mrb[22].mxu0  ;;  %v645_v27 = vpop.f32.mrb[22].mxu1 }
 0x13b   : > { %v675_v28 = vmax.f32 %v579_v21, 0.0  ;;  %v582_v29 = vadd.f32 %v1694_v45, %v581_v26  ;;  %v583_v30 = vpop.f32.mrb[23].mxu0  ;;  %v691_v31 = vmax.f32 %v643_v23, 0.0  ;;  %754 = vadd.xlane.f32.xlu1 %v713_v24  ;;  %784 = vadd.xlane.f32.xlu0 %v728_v17  ;;  %v647_v32 = vpop.f32.mrb[23].mxu1  ;;  %v646_v34 = vadd.f32 %v1694_v45, %v645_v27 }
 0x13d   : > { %v676_v33 = vmax.f32 %v582_v29, 0.0  ;;  %v714_v36 = vmul.f32 %v1701_v54, %v675_v28  ;;  %v730_v37 = vmul.f32 %v1701_v54, %v691_v31  ;;  %v692_v40 = vmax.f32 %v646_v34, 0.0 }
 0x13f   : > { %786 = vadd.xlane.f32.xlu1 %v729_v35  ;;  %756 = vadd.xlane.f32.xlu0 %v714_v36  ;;  %v715_v44 = vmul.f32 %v1701_v54, %v676_v33  ;;  %v731_v57 = vmul.f32 %v1701_v54, %v692_v40 }
 0x140   : > { %v586_v38 = vpop.f32.mrb[24].mxu0  ;;  %v650_v39 = vpop.f32.mrb[24].mxu1 }
 0x141   : > { %v587_v41 = vadd.f32 %v1694_v45, %v586_v38  ;;  %v588_v42 = vpop.f32.mrb[25].mxu0  ;;  %v651_v43 = vadd.f32 %v1694_v45, %v650_v39  ;;  %v652_v46 = vpop.f32.mrb[25].mxu1 }
 0x142   : > { %v589_v47 = vpop.f32.mrb[26].mxu0  ;;  %v653_v48 = vpop.f32.mrb[26].mxu1 }
 0x143   : > { %v677_v49 = vmax.f32 %v587_v41, 0.0  ;;  %v590_v50 = vadd.f32 %v1694_v45, %v589_v47  ;;  %v591_v51 = vpop.f32.mrb[27].mxu0  ;;  %v693_v52 = vmax.f32 %v651_v43, 0.0  ;;  %758 = vadd.xlane.f32.xlu1 %v715_v44  ;;  %788 = vadd.xlane.f32.xlu0 %v730_v37  ;;  %v655_v53 = vpop.f32.mrb[27].mxu1  ;;  %v654_v56 = vadd.f32 %v1694_v45, %v653_v48 }
 0x145   : > { %v678_v55 = vmax.f32 %v590_v50, 0.0  ;;  %v716_v58 = vmul.f32 %v1701_v54, %v677_v49  ;;  %v732_v59 = vmul.f32 %v1701_v54, %v693_v52  ;;  %v694_v62 = vmax.f32 %v654_v56, 0.0 }
 0x147   : > { %790 = vadd.xlane.f32.xlu1 %v731_v57  ;;  %760 = vadd.xlane.f32.xlu0 %v716_v58  ;;  %v717_v2 = vmul.f32 %v1701_v54, %v678_v55  ;;  %v733_v14 = vmul.f32 %v1701_v54, %v694_v62 }
 0x148   : > { %v594_v60 = vpop.f32.mrb[28].mxu0  ;;  %v658_v61 = vpop.f32.mrb[28].mxu1 }
 0x149   : > { %v595_v63 = vadd.f32 %v1694_v45, %v594_v60  ;;  %v596_v0 = vpop.f32.mrb[29].mxu0  ;;  %v659_v1 = vadd.f32 %v1694_v45, %v658_v61  ;;  %v660_v3 = vpop.f32.mrb[29].mxu1 }
 0x14a   : > { %v597_v4 = vpop.f32.mrb[30].mxu0  ;;  %v661_v5 = vpop.f32.mrb[30].mxu1 }
 0x14b   : > { %v679_v6 = vmax.f32 %v595_v63, 0.0  ;;  %v598_v7 = vadd.f32 %v1694_v45, %v597_v4  ;;  %v599_v8 = vpop.f32.mrb[31].mxu0  ;;  %v695_v9 = vmax.f32 %v659_v1, 0.0  ;;  %762 = vadd.xlane.f32.xlu1 %v717_v2  ;;  %v662_v10 = vadd.f32 %v1694_v45, %v661_v5  ;;  %792 = vadd.xlane.f32.xlu0 %v732_v59  ;;  %v663_v11 = vpop.f32.mrb[31].mxu1 }
 0x14c   : > { %v1766_v45 = vstv %s800_s18 }
 0x14d   : > { %v680_v12 = vmax.f32 %v598_v7, 0.0  ;;  %v696_v13 = vmax.f32 %v662_v10, 0.0  ;;  %v718_v15 = vmul.f32 %v1701_v54, %v679_v6  ;;  %v734_v16 = vmul.f32 %v1701_v54, %v695_v9 }
 0x14f   : > { %794 = vadd.xlane.f32.xlu1 %v733_v14  ;;  %764 = vadd.xlane.f32.xlu0 %v718_v15  ;;  %v735_v17 = vmul.f32 %v1701_v54, %v696_v13  ;;  %v719_v18 = vmul.f32 %v1701_v54, %v680_v12 }
 0x153   : > { %766 = vadd.xlane.f32.xlu1 %v719_v18  ;;  %796 = vadd.xlane.f32.xlu0 %v734_v16 }
 0x157   : > { %798 = vadd.xlane.f32.xlu1 %v735_v17 }
 0x1a4   : > { %v737_v19 = vpop.xlane.xlu0 %736 }
 0x1a5   : > { %v802_v20 = vadd.f32 %v1766_v45, %v737_v19 }
 0x1a6   : > { %v771_v21 = vpop.xlane.xlu1 %770 }
 0x1a7   : > { %835 = vst.msk [vmem:[%s1769_s24] sm:$0xff] %vm834_vm1, %v802_v20  ;;  %v819_v54 = vadd.f32 %v1766_v45, %v771_v21 }
 0x1a8   : > { %v769_v22 = vpop.xlane.xlu0 %768 }
 0x1a9   : > { %852 = vst.msk [vmem:[%s1769_s24 + $0x88] sm:$0xff] %vm834_vm1, %v819_v54  ;;  %v818_v23 = vadd.f32 %v1766_v45, %v769_v22 }
 0x1ab   : > { %851 = vst.msk [vmem:[%s1769_s24 + $0x80] sm:$0xff] %vm834_vm1, %v818_v23 }
 0x1ac   : > { %v741_v24 = vpop.xlane.xlu1 %740  ;;  %v739_v25 = vpop.xlane.xlu0 %738 }
 0x1ad   : > { %v804_v26 = vadd.f32 %v1766_v45, %v741_v24  ;;  %v803_v27 = vadd.f32 %v1766_v45, %v739_v25 }
 0x1af   : > { %837 = vst.msk [vmem:[%s1769_s24 + $0x10] sm:$0xff] %vm834_vm1, %v804_v26  ;;  %836 = vst.msk [vmem:[%s1769_s24 + $0x8] sm:$0xff] %vm834_vm1, %v803_v27 }
 0x1b0   : > { %v743_v28 = vpop.xlane.xlu1 %742  ;;  %v773_v29 = vpop.xlane.xlu0 %772 }
 0x1b1   : > { %v805_v30 = vadd.f32 %v1766_v45, %v743_v28  ;;  %v820_v31 = vadd.f32 %v1766_v45, %v773_v29 }
 0x1b3   : > { %838 = vst.msk [vmem:[%s1769_s24 + $0x18] sm:$0xff] %vm834_vm1, %v805_v30  ;;  %853 = vst.msk [vmem:[%s1769_s24 + $0x90] sm:$0xff] %vm834_vm1, %v820_v31 }
 0x1b4   : > { %v775_v32 = vpop.xlane.xlu1 %774  ;;  %v745_v33 = vpop.xlane.xlu0 %744 }
 0x1b5   : > { %v821_v34 = vadd.f32 %v1766_v45, %v775_v32  ;;  %v806_v35 = vadd.f32 %v1766_v45, %v745_v33 }
 0x1b7   : > { %854 = vst.msk [vmem:[%s1769_s24 + $0x98] sm:$0xff] %vm834_vm1, %v821_v34  ;;  %839 = vst.msk [vmem:[%s1769_s24 + $0x20] sm:$0xff] %vm834_vm1, %v806_v35 }
 0x1b8   : > { %v747_v36 = vpop.xlane.xlu1 %746  ;;  %v777_v37 = vpop.xlane.xlu0 %776 }
 0x1b9   : > { %v807_v38 = vadd.f32 %v1766_v45, %v747_v36  ;;  %v822_v39 = vadd.f32 %v1766_v45, %v777_v37 }
 0x1bb   : > { %840 = vst.msk [vmem:[%s1769_s24 + $0x28] sm:$0xff] %vm834_vm1, %v807_v38  ;;  %855 = vst.msk [vmem:[%s1769_s24 + $0xa0] sm:$0xff] %vm834_vm1, %v822_v39 }
 0x1bc   : > { %v779_v40 = vpop.xlane.xlu1 %778  ;;  %v749_v41 = vpop.xlane.xlu0 %748 }
 0x1bd   : > { %v823_v42 = vadd.f32 %v1766_v45, %v779_v40  ;;  %v808_v43 = vadd.f32 %v1766_v45, %v749_v41 }
 0x1bf   : > { %856 = vst.msk [vmem:[%s1769_s24 + $0xa8] sm:$0xff] %vm834_vm1, %v823_v42  ;;  %841 = vst.msk [vmem:[%s1769_s24 + $0x30] sm:$0xff] %vm834_vm1, %v808_v43 }
 0x1c0   : > { %v751_v44 = vpop.xlane.xlu1 %750  ;;  %v781_v46 = vpop.xlane.xlu0 %780 }
 0x1c1   : > { %v809_v47 = vadd.f32 %v1766_v45, %v751_v44  ;;  %v824_v48 = vadd.f32 %v1766_v45, %v781_v46 }
 0x1c3   : > { %842 = vst.msk [vmem:[%s1769_s24 + $0x38] sm:$0xff] %vm834_vm1, %v809_v47  ;;  %857 = vst.msk [vmem:[%s1769_s24 + $0xb0] sm:$0xff] %vm834_vm1, %v824_v48 }
 0x1c4   : > { %v783_v49 = vpop.xlane.xlu1 %782  ;;  %v753_v50 = vpop.xlane.xlu0 %752 }
 0x1c5   : > { %v825_v51 = vadd.f32 %v1766_v45, %v783_v49  ;;  %v810_v52 = vadd.f32 %v1766_v45, %v753_v50 }
 0x1c7   : > { %858 = vst.msk [vmem:[%s1769_s24 + $0xb8] sm:$0xff] %vm834_vm1, %v825_v51  ;;  %843 = vst.msk [vmem:[%s1769_s24 + $0x40] sm:$0xff] %vm834_vm1, %v810_v52 }
 0x1c8   : > { %v755_v53 = vpop.xlane.xlu1 %754  ;;  %v785_v55 = vpop.xlane.xlu0 %784 }
 0x1c9   : > { %v811_v56 = vadd.f32 %v1766_v45, %v755_v53  ;;  %v826_v57 = vadd.f32 %v1766_v45, %v785_v55 }
 0x1cb   : > { %844 = vst.msk [vmem:[%s1769_s24 + $0x48] sm:$0xff] %vm834_vm1, %v811_v56  ;;  %859 = vst.msk [vmem:[%s1769_s24 + $0xc0] sm:$0xff] %vm834_vm1, %v826_v57 }
 0x1cc   : > { %v787_v58 = vpop.xlane.xlu1 %786  ;;  %v757_v59 = vpop.xlane.xlu0 %756 }
 0x1cd   : > { %v827_v60 = vadd.f32 %v1766_v45, %v787_v58  ;;  %v812_v61 = vadd.f32 %v1766_v45, %v757_v59 }
 0x1cf   : > { %860 = vst.msk [vmem:[%s1769_s24 + $0xc8] sm:$0xff] %vm834_vm1, %v827_v60  ;;  %845 = vst.msk [vmem:[%s1769_s24 + $0x50] sm:$0xff] %vm834_vm1, %v812_v61 }
 0x1d0   : > { %v759_v62 = vpop.xlane.xlu1 %758  ;;  %v789_v63 = vpop.xlane.xlu0 %788 }
 0x1d1   : > { %v813_v0 = vadd.f32 %v1766_v45, %v759_v62  ;;  %v828_v1 = vadd.f32 %v1766_v45, %v789_v63 }
 0x1d3   : > { %846 = vst.msk [vmem:[%s1769_s24 + $0x58] sm:$0xff] %vm834_vm1, %v813_v0  ;;  %861 = vst.msk [vmem:[%s1769_s24 + $0xd0] sm:$0xff] %vm834_vm1, %v828_v1 }
 0x1d4   : > { %v791_v2 = vpop.xlane.xlu1 %790  ;;  %v761_v3 = vpop.xlane.xlu0 %760 }
 0x1d5   : > { %v829_v4 = vadd.f32 %v1766_v45, %v791_v2  ;;  %v814_v5 = vadd.f32 %v1766_v45, %v761_v3 }
 0x1d7   : > { %862 = vst.msk [vmem:[%s1769_s24 + $0xd8] sm:$0xff] %vm834_vm1, %v829_v4  ;;  %847 = vst.msk [vmem:[%s1769_s24 + $0x60] sm:$0xff] %vm834_vm1, %v814_v5 }
 0x1d8   : > { %v763_v6 = vpop.xlane.xlu1 %762  ;;  %v793_v7 = vpop.xlane.xlu0 %792 }
 0x1d9   : > { %v815_v8 = vadd.f32 %v1766_v45, %v763_v6  ;;  %v830_v9 = vadd.f32 %v1766_v45, %v793_v7 }
 0x1db   : > { %848 = vst.msk [vmem:[%s1769_s24 + $0x68] sm:$0xff] %vm834_vm1, %v815_v8  ;;  %863 = vst.msk [vmem:[%s1769_s24 + $0xe0] sm:$0xff] %vm834_vm1, %v830_v9 }
 0x1dc   : > { %v795_v10 = vpop.xlane.xlu1 %794  ;;  %v765_v11 = vpop.xlane.xlu0 %764 }
 0x1dd   : > { %v831_v12 = vadd.f32 %v1766_v45, %v795_v10  ;;  %v816_v13 = vadd.f32 %v1766_v45, %v765_v11 }
 0x1df   : > { %864 = vst.msk [vmem:[%s1769_s24 + $0xe8] sm:$0xff] %vm834_vm1, %v831_v12  ;;  %849 = vst.msk [vmem:[%s1769_s24 + $0x70] sm:$0xff] %vm834_vm1, %v816_v13 }
 0x1e0   : > { %v767_v14 = vpop.xlane.xlu1 %766  ;;  %v797_v15 = vpop.xlane.xlu0 %796 }
 0x1e1   : > { %v817_v16 = vadd.f32 %v1766_v45, %v767_v14  ;;  %v832_v17 = vadd.f32 %v1766_v45, %v797_v15  ;;  %873 = sbr.rel (!%p1537_p4) target bundleno = 544 (0x220), region = 44 }
 0x1e3   : > { %850 = vst.msk [vmem:[%s1769_s24 + $0x78] sm:$0xff] %vm834_vm1, %v817_v16  ;;  %865 = vst.msk [vmem:[%s1769_s24 + $0xf0] sm:$0xff] %vm834_vm1, %v832_v17 }
 0x1e4   : > { %v799_v18 = vpop.xlane.xlu1 %798 }
 0x1e5   : > { %v833_v19 = vadd.f32 %v1766_v45, %v799_v18 }
 0x1e7   : > { %866 = vst.msk [vmem:[%s1769_s24 + $0xf8] sm:$0xff] %vm834_vm1, %v833_v19 }
 0x1e8   : > { %s2021_s20 = smov (!%p876_p8, %s875_s20), 32 }
 0x1e9   : > { %s1246_s7 = sshll.u32 %s2021_s20, 7 }
 0x1ea   : > { %p1249_p9 = scmp.eq.s32.totalorder %s1246_s7, 0 }
 0x1eb   : > { %s1879_s8 = sshrl.u32 (!%p1249_p9), %s2021_s20, 5 }
 0x1ec   : > { %884 = sbr.rel (%p1249_p9) target bundleno = 544 (0x220), region = 48  ;;  %p1250_p10 = scmp.le.s32.totalorder (!%p1249_p9), %s1879_s8, 0 }
 0x1f3   : > { %1162 = sbr.rel (%p1250_p10) target bundleno = 523 (0x20b), region = 124  ;;  %s2012_s4 = smov (!%p1250_p10), %s1873_s6 }
 0x1f4   : > { %s2013_s27 = smov (!%p1250_p10), %s1769_s24  ;;  %s1888_s30 = smov (!%p1250_p10), 0  }
 0x1f5   : > { %s1890_s9 = smov (!%p1250_p10), 0  }
 0x1fa LB: >> { %v1008_v45 = vld [vmem:[%s1452_s27] sm:$0xff]  ;;  %v1010_v20 = vld [vmem:[%s1452_s27 + $0x8] sm:$0xff]  ;;  %v1012_v21 = vld [vmem:[%s1452_s27 + $0x10] sm:$0xff]  ;;  %s1072_s10 = sadd.s32 1, %s1456_s30  ;;  %s1002_s9 = sadd.s32 1, %s1460_s9   ;;  %s1460_s9 = sphi %s1890_s9, %s1002_s9   ;;  %s1456_s30 = sphi %s1888_s30, %s2016_s30   ;;  %s1452_s27 = sphi %s2013_s27, %s2015_s27   ;;  %s1448_s4 = sphi %s2012_s4, %s2014_s4  }
 0x1fb   : >> { %1009 = vst [vmem:[%s1448_s4] sm:$0xff] %v1008_v45  ;;  %1011 = vst [vmem:[%s1448_s4 + $0x8] sm:$0xff] %v1010_v20  ;;  %v1014_v54 = vld [vmem:[%s1452_s27 + $0x18] sm:$0xff]  ;;  %v1016_v22 = vld [vmem:[%s1452_s27 + $0x20] sm:$0xff]  ;;  %p1073_p11 = scmp.ge.s32.totalorder %s1072_s10, %s1879_s8  ;;  %p1001_p12 = scmp.ge.s32.totalorder %s1002_s9, %s1879_s8 }
 0x1fc   : >> { %1013 = vst [vmem:[%s1448_s4 + $0x10] sm:$0xff] %v1012_v21  ;;  %v1018_v23 = vld [vmem:[%s1452_s27 + $0x28] sm:$0xff]  ;;  %1015 = vst [vmem:[%s1448_s4 + $0x18] sm:$0xff] %v1014_v54  ;;  %v1020_v24 = vld [vmem:[%s1452_s27 + $0x30] sm:$0xff] }
 0x1fd   : >> { %1017 = vst [vmem:[%s1448_s4 + $0x20] sm:$0xff] %v1016_v22  ;;  %1019 = vst [vmem:[%s1448_s4 + $0x28] sm:$0xff] %v1018_v23  ;;  %v1022_v25 = vld [vmem:[%s1452_s27 + $0x38] sm:$0xff]  ;;  %v1024_v26 = vld [vmem:[%s1452_s27 + $0x40] sm:$0xff]  ;;  %s2023_s10 = smov (%p1073_p11, %s1072_s10), 0 }
 0x1fe   : >> { %1021 = vst [vmem:[%s1448_s4 + $0x30] sm:$0xff] %v1020_v24  ;;  %1023 = vst [vmem:[%s1448_s4 + $0x38] sm:$0xff] %v1022_v25  ;;  %v1026_v27 = vld [vmem:[%s1452_s27 + $0x48] sm:$0xff]  ;;  %v1028_v28 = vld [vmem:[%s1452_s27 + $0x50] sm:$0xff]  ;;  %s1251_s11 = sshll.u32 %s2023_s10, 8  ;;  %s2016_s30 = smov %s2023_s10 }
 0x1ff   : >> { %1025 = vst [vmem:[%s1448_s4 + $0x40] sm:$0xff] %v1024_v26  ;;  %v1030_v29 = vld [vmem:[%s1452_s27 + $0x58] sm:$0xff]  ;;  %1027 = vst [vmem:[%s1448_s4 + $0x48] sm:$0xff] %v1026_v27  ;;  %v1032_v30 = vld [vmem:[%s1452_s27 + $0x60] sm:$0xff]  ;;  %s1946_s12 = scalar_lea.vmem %s1769_s24, %s1251_s11 [#allocation3]   ;;  %s1078_s13 = scalar_lea.vmem %s1873_s6, %s1251_s11  }
 0x200   : >> { %1029 = vst [vmem:[%s1448_s4 + $0x50] sm:$0xff] %v1028_v28  ;;  %1031 = vst [vmem:[%s1448_s4 + $0x58] sm:$0xff] %v1030_v29  ;;  %v1034_v31 = vld [vmem:[%s1452_s27 + $0x68] sm:$0xff]  ;;  %v1036_v32 = vld [vmem:[%s1452_s27 + $0x70] sm:$0xff] }
 0x201   : >> { %1033 = vst [vmem:[%s1448_s4 + $0x60] sm:$0xff] %v1032_v30  ;;  %1035 = vst [vmem:[%s1448_s4 + $0x68] sm:$0xff] %v1034_v31  ;;  %v1038_v33 = vld [vmem:[%s1452_s27 + $0x78] sm:$0xff]  ;;  %v1040_v34 = vld [vmem:[%s1452_s27 + $0x80] sm:$0xff] }
 0x202   : >> { %1037 = vst [vmem:[%s1448_s4 + $0x70] sm:$0xff] %v1036_v32  ;;  %v1042_v35 = vld [vmem:[%s1452_s27 + $0x88] sm:$0xff]  ;;  %1039 = vst [vmem:[%s1448_s4 + $0x78] sm:$0xff] %v1038_v33  ;;  %v1044_v36 = vld [vmem:[%s1452_s27 + $0x90] sm:$0xff] }
 0x203   : >> { %1041 = vst [vmem:[%s1448_s4 + $0x80] sm:$0xff] %v1040_v34  ;;  %1043 = vst [vmem:[%s1448_s4 + $0x88] sm:$0xff] %v1042_v35  ;;  %v1046_v37 = vld [vmem:[%s1452_s27 + $0x98] sm:$0xff]  ;;  %v1048_v38 = vld [vmem:[%s1452_s27 + $0xa0] sm:$0xff] }
 0x204   : >> { %1045 = vst [vmem:[%s1448_s4 + $0x90] sm:$0xff] %v1044_v36  ;;  %1047 = vst [vmem:[%s1448_s4 + $0x98] sm:$0xff] %v1046_v37  ;;  %v1050_v39 = vld [vmem:[%s1452_s27 + $0xa8] sm:$0xff]  ;;  %v1052_v40 = vld [vmem:[%s1452_s27 + $0xb0] sm:$0xff]  ;;  %1004 = sbr.rel (!%p1001_p12) target bundleno = 506 (0x1fa), region = 130 }
 0x205   : >> { %1049 = vst [vmem:[%s1448_s4 + $0xa0] sm:$0xff] %v1048_v38  ;;  %v1054_v41 = vld [vmem:[%s1452_s27 + $0xb8] sm:$0xff]  ;;  %1051 = vst [vmem:[%s1448_s4 + $0xa8] sm:$0xff] %v1050_v39  ;;  %v1056_v42 = vld [vmem:[%s1452_s27 + $0xc0] sm:$0xff] }
 0x206   : >> { %1053 = vst [vmem:[%s1448_s4 + $0xb0] sm:$0xff] %v1052_v40  ;;  %1055 = vst [vmem:[%s1448_s4 + $0xb8] sm:$0xff] %v1054_v41  ;;  %v1058_v43 = vld [vmem:[%s1452_s27 + $0xc8] sm:$0xff]  ;;  %v1060_v44 = vld [vmem:[%s1452_s27 + $0xd0] sm:$0xff] }
 0x207   : >> { %1057 = vst [vmem:[%s1448_s4 + $0xc0] sm:$0xff] %v1056_v42  ;;  %1059 = vst [vmem:[%s1448_s4 + $0xc8] sm:$0xff] %v1058_v43  ;;  %v1062_v46 = vld [vmem:[%s1452_s27 + $0xd8] sm:$0xff]  ;;  %v1064_v47 = vld [vmem:[%s1452_s27 + $0xe0] sm:$0xff] }
 0x208   : >> { %1061 = vst [vmem:[%s1448_s4 + $0xd0] sm:$0xff] %v1060_v44  ;;  %v1066_v48 = vld [vmem:[%s1452_s27 + $0xe8] sm:$0xff]  ;;  %1063 = vst [vmem:[%s1448_s4 + $0xd8] sm:$0xff] %v1062_v46  ;;  %v1068_v49 = vld [vmem:[%s1452_s27 + $0xf0] sm:$0xff] }
 0x209   : >> { %1065 = vst [vmem:[%s1448_s4 + $0xe0] sm:$0xff] %v1064_v47  ;;  %1067 = vst [vmem:[%s1448_s4 + $0xe8] sm:$0xff] %v1066_v48  ;;  %v1070_v50 = vld [vmem:[%s1452_s27 + $0xf8] sm:$0xff]  ;;  %s2015_s27 = smov %s1946_s12 }
 0x20a   : >> { %1069 = vst [vmem:[%s1448_s4 + $0xf0] sm:$0xff] %v1068_v49  ;;  %1071 = vst [vmem:[%s1448_s4 + $0xf8] sm:$0xff] %v1070_v50  ;;  %s2014_s4 = smov %s1078_s13 }
 0x20b PF: > { %s1987_s15 = sand.u32 31, %s2021_s20   ;;  %s1263_s16 = sshll.u32 %s1879_s8, 8 }
 0x20c   : > { %s1083_s14 = scalar_lea.vmem %s1769_s24, %s1263_s16 [#allocation3]   ;;  %s1085_s17 = scalar_lea.vmem %s1873_s6, %s1263_s16  }
 0x20d   : > { %p1256_p13 = scmp.le.s32.totalorder %s1987_s15, 0 }
 0x20e   : > { %s1462_s18 = smov (!%p1256_p13), %s1085_s17   ;;  %s1466_s19 = smov (!%p1256_p13), %s1083_s14  }
 0x20f   : > { %1176 = sbr.rel (%p1256_p13) target bundleno = 544 (0x220), region = 135  ;;  %s1470_s22 = smov (!%p1256_p13), 0  }
 0x210   : > { %s1474_s25 = smov (!%p1256_p13), 0  }
 0x216 LB: >> { %v1095_v51 = vld [vmem:[%s1468_s19] sm:$0xff]  ;;  %s1097_s20 = sadd.s32 1, %s1472_s22  ;;  %s1089_s25 = sadd.s32 1, %s1476_s25   ;;  %s1476_s25 = sphi %s1474_s25, %s1089_s25   ;;  %s1472_s22 = sphi %s1470_s22, %s1471_s22   ;;  %s1468_s19 = sphi %s1466_s19, %s1102_s19   ;;  %s1464_s18 = sphi %s1462_s18, %s1103_s18  }
 0x217   : >> { %1096 = vst [vmem:[%s1464_s18] sm:$0xff] %v1095_v51  ;;  %p1098_p0 = scmp.ge.s32.totalorder %s1097_s20, %s1987_s15  ;;  %p1088_p1 = scmp.ge.s32.totalorder %s1089_s25, %s1987_s15 }
 0x219   : >> { %s2025_s20 = smov (%p1098_p0, %s1097_s20), 0  ;;  %1091 = sbr.rel (!%p1088_p1) target bundleno = 534 (0x216), region = 141 }
 0x21a   : >> { %s1257_s24 = sshll.u32 %s2025_s20, 3  ;;  %s1471_s22 = smov %s2025_s20  }
 0x21b   : >> { %s1102_s19 = scalar_lea.vmem %s1083_s14, %s1257_s24 [#allocation3]   ;;  %s1103_s18 = scalar_lea.vmem %s1085_s17, %s1257_s24  }
 0x220 PF: > { %p13_p2 = scmp.ge.s32.totalorder %s1527_s23, 5   ;;  %s2017_s20 = smov %s1440_s21 }
 0x221   : > { %s2018_s21 = smov %s1535_s26  ;;  %s2019_s22 = smov %s1527_s23 }
 0x222   :  { %15 = sbr.rel (!%p13_p2) target bundleno = 4 (0x4), region = 152 }

</bundles_post_ra>
